<compile_context>
chip_gen: v7x
topology: tpu7x:2x2x1
jax: 0.10.0
libtpu: 0.0.40
codegen_flags: <defaults>
</compile_context>

<pallas_src>
from dataclasses import dataclass
from typing import Dict, Optional

import jax
import jax.numpy as jnp
from jax.experimental import pallas as pl
from jax.experimental.pallas import tpu as pltpu


@dataclass
class ExpertAction:
    discrete: Optional[Dict[str, int]] = None
    continuous: Optional[Dict[str, float]] = None


_TILE_B = 256  # rows per kernel invocation when gridding (full v6e/v7x MXU tile)


# ----------------------------------------------------------------------------
# Pallas kernel factory: MLP + fused heads + argmax / gaussian-sample epilogue
# ----------------------------------------------------------------------------
def _make_expert_kernel(disc_slices):
    disc_slices = tuple((int(s), int(n)) for (s, n) in disc_slices)

    def kernel(x_ref, eps_ref, win_ref, wpack_ref, b_ref, out_ref):
        f32 = jnp.float32
        bf16 = jnp.bfloat16

        b1 = b_ref[0:1, :]
        gamma = b_ref[1:2, :]
        beta = b_ref[2:3, :]
        b2 = b_ref[3:4, 0:64]
        bh1 = b_ref[4:5, :]
        bh2 = b_ref[5:6, :]

        # --- feature extractor: Linear(input_dim,128) -> ReLU -> LayerNorm ---
        x = x_ref[...].astype(bf16)
        h = jnp.dot(x, win_ref[...], preferred_element_type=f32) + b1
        h = jnp.maximum(h, 0.0)
        mean = jnp.mean(h, axis=-1, keepdims=True)
        var = jnp.mean((h - mean) ** 2, axis=-1, keepdims=True)
        h = (h - mean) * jax.lax.rsqrt(var + 1e-5) * gamma + beta

        # --- static slices of the packed weight tensor (128-aligned blocks) ---
        w_feat = wpack_ref[:, 0:64]          # [128, 64]
        w_h1 = wpack_ref[0:64, 128:256]      # [64, 128] = [wd1 | wc1]
        w_h2 = wpack_ref[:, 256:384]         # [128, 128] block-diag second layer

        # --- Linear(128,64) + Tanh ---
        feat = jnp.tanh(
            jnp.dot(h.astype(bf16), w_feat, preferred_element_type=f32) + b2
        )                                                        # [B, 64]

        # --- fused heads: one matmul for both first layers, one for both second
        hh = jnp.maximum(
            jnp.dot(feat.astype(bf16), w_h1, preferred_element_type=f32) + bh1,
            0.0,
        )                                                        # [B, 128]
        y2 = jnp.dot(hh.astype(bf16), w_h2, preferred_element_type=f32) + bh2
        # y2: lanes 0:Dd = discrete logits, 64:64+Dc = mu, 96:96+Dc = logvar

        # --- epilogue: per-parameter argmax (softmax dropped, argmax is exact) -
        lane = jax.lax.broadcasted_iota(jnp.int32, y2.shape, 1)
        lane_f = lane.astype(f32)
        disc = jnp.zeros_like(y2)
        for p, (s, n) in enumerate(disc_slices):
            m = (lane >= s) & (lane < s + n)
            vals = jnp.where(m, y2, -jnp.inf)
            mx = jnp.max(vals, axis=-1, keepdims=True)
            first = jnp.min(
                jnp.where(m & (vals >= mx), lane_f, 65536.0),
                axis=-1, keepdims=True,
            )
            disc = disc + jnp.where(lane == p, first - float(s), 0.0)

        # --- epilogue: gaussian sample + tanh for continuous params ----------
        mu = y2[:, 64:96]
        lv = y2[:, 96:128]
        eps = eps_ref[:, 64:96]
        cont = jnp.tanh(mu + eps * jnp.exp(0.5 * lv))            # [B, 32]

        out_ref[:, 0:64] = disc[:, 0:64]
        out_ref[:, 64:96] = cont
        out_ref[:, 96:128] = jnp.zeros_like(cont)

    return kernel


def _expert_forward(kernel, x, eps, w_in, w_pack, b_pack):
    """x: [B_pad, input_dim] f32 (B_pad multiple of 8) -> [B_pad, 128] f32."""
    B, input_dim = x.shape
    out_shape = jax.ShapeDtypeStruct((B, 128), jnp.float32)

    if B <= _TILE_B:
        # whole problem (weights + batch) is VMEM-resident; no grid overhead.
        vmem = pl.BlockSpec(memory_space=pltpu.MemorySpace.VMEM)
        call = pl.pallas_call(
            kernel, out_shape=out_shape, in_specs=[vmem] * 5, out_specs=vmem
        )
    else:
        # big batches: 256-row tiles, batch axis parallel (v7x 2-TC / megacore).
        nb = B // _TILE_B
        call = pl.pallas_call(
            kernel,
            out_shape=out_shape,
            grid=(nb,),
            in_specs=[
                pl.BlockSpec((_TILE_B, input_dim), lambda i: (i, 0)),
                pl.BlockSpec((_TILE_B, 128), lambda i: (i, 0)),
                pl.BlockSpec((input_dim, 128), lambda i: (0, 0)),
                pl.BlockSpec(w_pack.shape, lambda i: (0, 0)),
                pl.BlockSpec(b_pack.shape, lambda i: (0, 0)),
            ],
            out_specs=pl.BlockSpec((_TILE_B, 128), lambda i: (i, 0)),
            compiler_params=pltpu.CompilerParams(
                dimension_semantics=("parallel",)
            ),
        )
    return call(x, eps, w_in, w_pack, b_pack)


# ----------------------------------------------------------------------------
# Module wrapper (parameter init + single-sync action-dict mapping)
# ----------------------------------------------------------------------------
class ParameterAwareExpertPallas:
    def __init__(self, input_dim: int, param_config: dict, key):
        self.param_config = param_config
        self.feature_dim = 64
        self.input_dim = input_dim
        # mirrors the PyTorch code exactly — continuous params contribute 1 each
        # to discrete_dims as well (those logits exist but are never used).
        self.discrete_dims = sum(
            len(v["options"]) if v["type"] == "discrete" else 1
            for v in param_config.values()
        )
        self.continuous_dims = sum(
            1 for v in param_config.values() if v["type"] == "continuous"
        )
        Dd, Dc = self.discrete_dims, self.continuous_dims
        assert Dd <= 64, "discrete logits must fit in lanes [0, 64)"
        assert Dc <= 32, "continuous params must fit in lanes [64, 96)"

        # argmax windows: ptr advances only over discrete params (matches the
        # PyTorch module's _map_discrete_actions convention).
        self._disc_slices = []
        ptr = 0
        for _, cfg in param_config.items():
            if cfg["type"] == "discrete":
                n = len(cfg["options"])
                self._disc_slices.append((ptr, n))
                ptr += n
        assert len(self._disc_slices) <= 64

        ks = jax.random.split(key, 6)

        def lin(k, fan_in, fan_out):
            kw, kb = jax.random.split(k)
            bound = 1.0 / jnp.sqrt(fan_in)
            w = jax.random.uniform(kw, (fan_in, fan_out), jnp.float32, -bound, bound)
            b = jax.random.uniform(kb, (fan_out,), jnp.float32, -bound, bound)
            return w, b

        w1, b1 = lin(ks[0], input_dim, 128)
        gamma = jnp.ones((128,), jnp.float32)
        beta = jnp.zeros((128,), jnp.float32)
        w2, b2 = lin(ks[1], 128, self.feature_dim)
        wd1, bd1 = lin(ks[2], self.feature_dim, 64)
        wd2, bd2 = lin(ks[3], 64, Dd)
        wc1, bc1 = lin(ks[4], self.feature_dim, 64)
        wc2, bc2 = lin(ks[5], 64, 2 * Dc)

        # --- bf16 packed weights ---------------------------------------------
        self.w_in = w1.astype(jnp.bfloat16)                    # [input_dim, 128]

        wpack = jnp.zeros((128, 384), jnp.float32)
        wpack = wpack.at[:, 0:64].set(w2)                      # feature layer
        wpack = wpack.at[0:64, 128:192].set(wd1)               # fused head-1
        wpack = wpack.at[0:64, 192:256].set(wc1)
        if Dd > 0:
            wpack = wpack.at[0:64, 256:256 + Dd].set(wd2)      # disc logits
        if Dc > 0:
            wpack = wpack.at[64:128, 320:320 + Dc].set(wc2[:, :Dc])   # mu
            wpack = wpack.at[64:128, 352:352 + Dc].set(wc2[:, Dc:])   # logvar
        self.w_pack = wpack.astype(jnp.bfloat16)

        b_pack = jnp.zeros((8, 128), jnp.float32)
        b_pack = b_pack.at[0].set(b1).at[1].set(gamma).at[2].set(beta)
        b_pack = b_pack.at[3, 0:64].set(b2)
        b_pack = b_pack.at[4, 0:64].set(bd1).at[4, 64:128].set(bc1)
        if Dd > 0:
            b_pack = b_pack.at[5, 0:Dd].set(bd2)
        if Dc > 0:
            b_pack = b_pack.at[5, 64:64 + Dc].set(bc2[:Dc])
            b_pack = b_pack.at[5, 96:96 + Dc].set(bc2[Dc:])
        self.b_pack = b_pack

        self._kernel = _make_expert_kernel(self._disc_slices)
        self._jit_forward = jax.jit(self._device_forward)

    # --- everything on-device: pad batch, draw eps, run the fused kernel -----
    def _device_forward(self, x2d, key):
        B = x2d.shape[0]
        if B <= _TILE_B:
            B_pad = max(8, ((B + 7) // 8) * 8)
        else:
            B_pad = ((B + _TILE_B - 1) // _TILE_B) * _TILE_B
        if B_pad != B:
            x2d = jnp.pad(x2d, ((0, B_pad - B), (0, 0)))

        eps = jnp.zeros((B_pad, 128), jnp.float32)
        if self.continuous_dims > 0:
            eps = eps.at[:, 64:64 + self.continuous_dims].set(
                jax.random.normal(key, (B_pad, self.continuous_dims), jnp.float32)
            )
        return _expert_forward(
            self._kernel, x2d, eps, self.w_in, self.w_pack, self.b_pack
        )

    # --- host-side mapping to action dicts (one device->host sync) -----------
    def _rows_to_actions(self, rows):
        actions = []
        for row in rows:
            discrete, continuous = {}, {}
            di = ci = 0
            for name, cfg in self.param_config.items():
                if cfg["type"] == "discrete":
                    discrete[name] = int(round(float(row[di])))
                    di += 1
                else:
                    continuous[name] = float(row[64 + ci])
                    ci += 1
            actions.append(ExpertAction(discrete=discrete, continuous=continuous))
        return actions

    def forward(self, x: jnp.ndarray, sample_key) -> ExpertAction:
        x2d = jnp.asarray(x, jnp.float32).reshape(1, self.input_dim)
        out = self._jit_forward(x2d, sample_key)
        row = jax.device_get(out)[0]                 # ONE host sync
        return self._rows_to_actions(row[None, :])[0]

    def forward_batch(self, xs: jnp.ndarray, sample_key):
        xs = jnp.asarray(xs, jnp.float32).reshape(-1, self.input_dim)
        B = xs.shape[0]
        out = self._jit_forward(xs, sample_key)
        rows = jax.device_get(out)[:B]               # ONE host sync
        return self._rows_to_actions(rows)


# ----------------------------------------------------------------------------
if __name__ == "__main__":
    param_config = {
        "kernel_size": {"type": "discrete", "options": [1, 3, 5]},
        "activation": {"type": "discrete", "options": ["relu", "gelu", "tanh", "silu"]},
        "learning_rate": {"type": "continuous", "range": [1e-5, 1e-1]},
        "dropout": {"type": "continuous", "range": [0.0, 0.5]},
    }

    input_dim = 32
    root = jax.random.PRNGKey(0)
    k_init, k_x, k_sample, k_batch = jax.random.split(root, 4)

    expert = ParameterAwareExpertPallas(input_dim, param_config, k_init)
    x = jax.random.normal(k_x, (input_dim,), jnp.float32)

    # run the fused kernel once (batch padded to 8 sublanes) and block on it
    out = expert._jit_forward(x.reshape(1, input_dim), k_sample)
    jax.block_until_ready(out)
    assert out.shape == (8, 128)

    # single-sample forward (same semantics as the PyTorch module)
    action = expert.forward(x, k_sample)
    assert isinstance(action.discrete, dict) and isinstance(action.continuous, dict)
    assert set(action.discrete.keys()) == {"kernel_size", "activation"}
    assert set(action.continuous.keys()) == {"learning_rate", "dropout"}
    assert 0 <= action.discrete["kernel_size"] < 3
    assert 0 <= action.discrete["activation"] < 4
    assert all(-1.0 <= v <= 1.0 for v in action.continuous.values())

    # batched forward exercising the gridded 256-row "parallel" path
    xs = jax.random.normal(k_batch, (300, input_dim), jnp.float32)
    actions = expert.forward_batch(xs, jax.random.fold_in(k_sample, 1))
    assert len(actions) == 300
    a0 = actions[0]
    assert 0 <= a0.discrete["kernel_size"] < 3
    assert 0 <= a0.discrete["activation"] < 4
    assert all(-1.0 <= v <= 1.0 for v in a0.continuous.values())

    print("KERNEL_OK")
</pallas_src>

<mosaic_0001>
module attributes {stable_mosaic.version = 11 : i64} {
  func.func @kernel(%arg0: memref<8x32xf32, #tpu.memory_space<vmem>>, %arg1: memref<8x128xf32, #tpu.memory_space<vmem>>, %arg2: memref<32x128xbf16, #tpu.memory_space<vmem>>, %arg3: memref<128x384xbf16, #tpu.memory_space<vmem>>, %arg4: memref<8x128xf32, #tpu.memory_space<vmem>>, %arg5: memref<8x128xf32, #tpu.memory_space<vmem>>) attributes {dimension_semantics = [], scalar_prefetch = 0 : i64, scratch_operands = 0 : i64, tpu.core_type = #tpu.core_type<tc>} {
    %c0 = arith.constant 0 : index
    %c0_0 = arith.constant 0 : index
    %0 = vector.load %arg4[%c0, %c0_0] : memref<8x128xf32, #tpu.memory_space<vmem>>, vector<1x128xf32>
    %c1 = arith.constant 1 : index
    %c0_1 = arith.constant 0 : index
    %1 = vector.load %arg4[%c1, %c0_1] : memref<8x128xf32, #tpu.memory_space<vmem>>, vector<1x128xf32>
    %c2 = arith.constant 2 : index
    %c0_2 = arith.constant 0 : index
    %2 = vector.load %arg4[%c2, %c0_2] : memref<8x128xf32, #tpu.memory_space<vmem>>, vector<1x128xf32>
    %c3 = arith.constant 3 : index
    %c0_3 = arith.constant 0 : index
    %3 = vector.load %arg4[%c3, %c0_3] : memref<8x128xf32, #tpu.memory_space<vmem>>, vector<1x64xf32>
    %c4 = arith.constant 4 : index
    %c0_4 = arith.constant 0 : index
    %4 = vector.load %arg4[%c4, %c0_4] : memref<8x128xf32, #tpu.memory_space<vmem>>, vector<1x128xf32>
    %c5 = arith.constant 5 : index
    %c0_5 = arith.constant 0 : index
    %5 = vector.load %arg4[%c5, %c0_5] : memref<8x128xf32, #tpu.memory_space<vmem>>, vector<1x128xf32>
    %c0_6 = arith.constant 0 : index
    %c0_7 = arith.constant 0 : index
    %6 = vector.load %arg0[%c0_6, %c0_7] : memref<8x32xf32, #tpu.memory_space<vmem>>, vector<8x32xf32>
    %7 = arith.truncf %6 : vector<8x32xf32> to vector<8x32xbf16>
    %c0_8 = arith.constant 0 : index
    %c0_9 = arith.constant 0 : index
    %8 = vector.load %arg2[%c0_8, %c0_9] : memref<32x128xbf16, #tpu.memory_space<vmem>>, vector<32x128xbf16>
    %cst = arith.constant dense<0.000000e+00> : vector<8x128xf32>
    %9 = tpu.matmul %7, %8, %cst {dimension_numbers = #tpu.dot_dimension_numbers<[1], [0], [0], [1], [0, 0, 1, 1], [], []>} : vector<8x32xbf16>, vector<32x128xbf16>, vector<8x128xf32> -> vector<8x128xf32>
    %10 = vector.broadcast %0 : vector<1x128xf32> to vector<8x128xf32>
    %11 = arith.addf %9, %10 : vector<8x128xf32>
    %cst_10 = arith.constant 0.000000e+00 : f32
    %12 = vector.broadcast %cst_10 : f32 to vector<8x128xf32>
    %13 = arith.maximumf %11, %12 : vector<8x128xf32>
    %cst_11 = arith.constant dense<0.000000e+00> : vector<8xf32>
    %14 = vector.multi_reduction <add>, %13, %cst_11 [1] : vector<8x128xf32> to vector<8xf32>
    %15 = vector.shape_cast %14 : vector<8xf32> to vector<8x1xf32>
    %cst_12 = arith.constant 1.280000e+02 : f32
    %16 = vector.broadcast %cst_12 : f32 to vector<8x1xf32>
    %17 = arith.divf %15, %16 : vector<8x1xf32>
    %18 = vector.broadcast %17 : vector<8x1xf32> to vector<8x128xf32>
    %19 = arith.subf %13, %18 : vector<8x128xf32>
    %20 = arith.mulf %19, %19 : vector<8x128xf32>
    %cst_13 = arith.constant dense<0.000000e+00> : vector<8xf32>
    %21 = vector.multi_reduction <add>, %20, %cst_13 [1] : vector<8x128xf32> to vector<8xf32>
    %22 = vector.shape_cast %21 : vector<8xf32> to vector<8x1xf32>
    %cst_14 = arith.constant 1.280000e+02 : f32
    %23 = vector.broadcast %cst_14 : f32 to vector<8x1xf32>
    %24 = arith.divf %22, %23 : vector<8x1xf32>
    %25 = vector.broadcast %17 : vector<8x1xf32> to vector<8x128xf32>
    %26 = arith.subf %13, %25 : vector<8x128xf32>
    %cst_15 = arith.constant 9.99999974E-6 : f32
    %27 = vector.broadcast %cst_15 : f32 to vector<8x1xf32>
    %28 = arith.addf %24, %27 : vector<8x1xf32>
    %29 = math.rsqrt %28 : vector<8x1xf32>
    %30 = vector.broadcast %29 : vector<8x1xf32> to vector<8x128xf32>
    %31 = arith.mulf %26, %30 : vector<8x128xf32>
    %32 = vector.broadcast %1 : vector<1x128xf32> to vector<8x128xf32>
    %33 = arith.mulf %31, %32 : vector<8x128xf32>
    %34 = vector.broadcast %2 : vector<1x128xf32> to vector<8x128xf32>
    %35 = arith.addf %33, %34 : vector<8x128xf32>
    %c0_16 = arith.constant 0 : index
    %c0_17 = arith.constant 0 : index
    %36 = vector.load %arg3[%c0_16, %c0_17] : memref<128x384xbf16, #tpu.memory_space<vmem>>, vector<128x64xbf16>
    %c0_18 = arith.constant 0 : index
    %c128 = arith.constant 128 : index
    %37 = vector.load %arg3[%c0_18, %c128] : memref<128x384xbf16, #tpu.memory_space<vmem>>, vector<64x128xbf16>
    %c0_19 = arith.constant 0 : index
    %c256 = arith.constant 256 : index
    %38 = vector.load %arg3[%c0_19, %c256] : memref<128x384xbf16, #tpu.memory_space<vmem>>, vector<128x128xbf16>
    %39 = arith.truncf %35 : vector<8x128xf32> to vector<8x128xbf16>
    %cst_20 = arith.constant dense<0.000000e+00> : vector<8x64xf32>
    %40 = tpu.matmul %39, %36, %cst_20 {dimension_numbers = #tpu.dot_dimension_numbers<[1], [0], [0], [1], [0, 0, 1, 1], [], []>} : vector<8x128xbf16>, vector<128x64xbf16>, vector<8x64xf32> -> vector<8x64xf32>
    %41 = vector.broadcast %3 : vector<1x64xf32> to vector<8x64xf32>
    %42 = arith.addf %40, %41 : vector<8x64xf32>
    %43 = math.tanh %42 : vector<8x64xf32>
    %44 = arith.truncf %43 : vector<8x64xf32> to vector<8x64xbf16>
    %cst_21 = arith.constant dense<0.000000e+00> : vector<8x128xf32>
    %45 = tpu.matmul %44, %37, %cst_21 {dimension_numbers = #tpu.dot_dimension_numbers<[1], [0], [0], [1], [0, 0, 1, 1], [], []>} : vector<8x64xbf16>, vector<64x128xbf16>, vector<8x128xf32> -> vector<8x128xf32>
    %46 = vector.broadcast %4 : vector<1x128xf32> to vector<8x128xf32>
    %47 = arith.addf %45, %46 : vector<8x128xf32>
    %cst_22 = arith.constant 0.000000e+00 : f32
    %48 = vector.broadcast %cst_22 : f32 to vector<8x128xf32>
    %49 = arith.maximumf %47, %48 : vector<8x128xf32>
    %50 = arith.truncf %49 : vector<8x128xf32> to vector<8x128xbf16>
    %cst_23 = arith.constant dense<0.000000e+00> : vector<8x128xf32>
    %51 = tpu.matmul %50, %38, %cst_23 {dimension_numbers = #tpu.dot_dimension_numbers<[1], [0], [0], [1], [0, 0, 1, 1], [], []>} : vector<8x128xbf16>, vector<128x128xbf16>, vector<8x128xf32> -> vector<8x128xf32>
    %52 = vector.broadcast %5 : vector<1x128xf32> to vector<8x128xf32>
    %53 = arith.addf %51, %52 : vector<8x128xf32>
    %54 = tpu.iota {dimensions = array<i32: 1>} : vector<8x128xi32>
    %55 = arith.sitofp %54 : vector<8x128xi32> to vector<8x128xf32>
    %cst_24 = arith.constant 0.000000e+00 : f32
    %56 = vector.broadcast %cst_24 : f32 to vector<8x128xf32>
    %c0_i32 = arith.constant 0 : i32
    %57 = vector.broadcast %c0_i32 : i32 to vector<8x128xi32>
    %58 = arith.cmpi sge, %54, %57 : vector<8x128xi32>
    %c3_i32 = arith.constant 3 : i32
    %59 = vector.broadcast %c3_i32 : i32 to vector<8x128xi32>
    %60 = arith.cmpi slt, %54, %59 : vector<8x128xi32>
    %61 = arith.andi %58, %60 : vector<8x128xi1>
    %cst_25 = arith.constant 0xFF800000 : f32
    %62 = vector.broadcast %cst_25 : f32 to vector<8x128xf32>
    %63 = arith.select %61, %53, %62 : vector<8x128xi1>, vector<8x128xf32>
    %cst_26 = arith.constant dense<0xFF800000> : vector<8xf32>
    %64 = vector.multi_reduction <maximumf>, %63, %cst_26 [1] : vector<8x128xf32> to vector<8xf32>
    %65 = vector.shape_cast %64 : vector<8xf32> to vector<8x1xf32>
    %66 = vector.broadcast %65 : vector<8x1xf32> to vector<8x128xf32>
    %67 = arith.cmpf oge, %63, %66 : vector<8x128xf32>
    %68 = arith.andi %61, %67 : vector<8x128xi1>
    %cst_27 = arith.constant 6.553600e+04 : f32
    %69 = vector.broadcast %cst_27 : f32 to vector<8x128xf32>
    %70 = arith.select %68, %55, %69 : vector<8x128xi1>, vector<8x128xf32>
    %cst_28 = arith.constant dense<0x7F800000> : vector<8xf32>
    %71 = vector.multi_reduction <minimumf>, %70, %cst_28 [1] : vector<8x128xf32> to vector<8xf32>
    %72 = vector.shape_cast %71 : vector<8xf32> to vector<8x1xf32>
    %c0_i32_29 = arith.constant 0 : i32
    %73 = vector.broadcast %c0_i32_29 : i32 to vector<8x128xi32>
    %74 = arith.cmpi eq, %54, %73 : vector<8x128xi32>
    %cst_30 = arith.constant 0.000000e+00 : f32
    %75 = vector.broadcast %cst_30 : f32 to vector<8x1xf32>
    %76 = arith.subf %72, %75 : vector<8x1xf32>
    %cst_31 = arith.constant 0.000000e+00 : f32
    %77 = vector.shape_cast %76 : vector<8x1xf32> to vector<8x1xf32>
    %78 = vector.broadcast %77 : vector<8x1xf32> to vector<8x128xf32>
    %79 = vector.broadcast %cst_31 : f32 to vector<8x128xf32>
    %80 = arith.select %74, %78, %79 : vector<8x128xi1>, vector<8x128xf32>
    %81 = arith.addf %56, %80 : vector<8x128xf32>
    %c3_i32_32 = arith.constant 3 : i32
    %82 = vector.broadcast %c3_i32_32 : i32 to vector<8x128xi32>
    %83 = arith.cmpi sge, %54, %82 : vector<8x128xi32>
    %c7_i32 = arith.constant 7 : i32
    %84 = vector.broadcast %c7_i32 : i32 to vector<8x128xi32>
    %85 = arith.cmpi slt, %54, %84 : vector<8x128xi32>
    %86 = arith.andi %83, %85 : vector<8x128xi1>
    %cst_33 = arith.constant 0xFF800000 : f32
    %87 = vector.broadcast %cst_33 : f32 to vector<8x128xf32>
    %88 = arith.select %86, %53, %87 : vector<8x128xi1>, vector<8x128xf32>
    %cst_34 = arith.constant dense<0xFF800000> : vector<8xf32>
    %89 = vector.multi_reduction <maximumf>, %88, %cst_34 [1] : vector<8x128xf32> to vector<8xf32>
    %90 = vector.shape_cast %89 : vector<8xf32> to vector<8x1xf32>
    %91 = vector.broadcast %90 : vector<8x1xf32> to vector<8x128xf32>
    %92 = arith.cmpf oge, %88, %91 : vector<8x128xf32>
    %93 = arith.andi %86, %92 : vector<8x128xi1>
    %cst_35 = arith.constant 6.553600e+04 : f32
    %94 = vector.broadcast %cst_35 : f32 to vector<8x128xf32>
    %95 = arith.select %93, %55, %94 : vector<8x128xi1>, vector<8x128xf32>
    %cst_36 = arith.constant dense<0x7F800000> : vector<8xf32>
    %96 = vector.multi_reduction <minimumf>, %95, %cst_36 [1] : vector<8x128xf32> to vector<8xf32>
    %97 = vector.shape_cast %96 : vector<8xf32> to vector<8x1xf32>
    %c1_i32 = arith.constant 1 : i32
    %98 = vector.broadcast %c1_i32 : i32 to vector<8x128xi32>
    %99 = arith.cmpi eq, %54, %98 : vector<8x128xi32>
    %cst_37 = arith.constant 3.000000e+00 : f32
    %100 = vector.broadcast %cst_37 : f32 to vector<8x1xf32>
    %101 = arith.subf %97, %100 : vector<8x1xf32>
    %cst_38 = arith.constant 0.000000e+00 : f32
    %102 = vector.shape_cast %101 : vector<8x1xf32> to vector<8x1xf32>
    %103 = vector.broadcast %102 : vector<8x1xf32> to vector<8x128xf32>
    %104 = vector.broadcast %cst_38 : f32 to vector<8x128xf32>
    %105 = arith.select %99, %103, %104 : vector<8x128xi1>, vector<8x128xf32>
    %106 = arith.addf %81, %105 : vector<8x128xf32>
    %107 = vector.extract_strided_slice %53 {offsets = [0, 64], sizes = [8, 32], strides = [1, 1]} : vector<8x128xf32> to vector<8x32xf32>
    %108 = vector.extract_strided_slice %53 {offsets = [0, 96], sizes = [8, 32], strides = [1, 1]} : vector<8x128xf32> to vector<8x32xf32>
    %c0_39 = arith.constant 0 : index
    %c64 = arith.constant 64 : index
    %109 = vector.load %arg1[%c0_39, %c64] : memref<8x128xf32, #tpu.memory_space<vmem>>, vector<8x32xf32>
    %cst_40 = arith.constant 5.000000e-01 : f32
    %110 = vector.broadcast %cst_40 : f32 to vector<8x32xf32>
    %111 = arith.mulf %110, %108 : vector<8x32xf32>
    %112 = math.exp %111 : vector<8x32xf32>
    %113 = arith.mulf %109, %112 : vector<8x32xf32>
    %114 = arith.addf %107, %113 : vector<8x32xf32>
    %115 = math.tanh %114 : vector<8x32xf32>
    %116 = vector.extract_strided_slice %106 {offsets = [0, 0], sizes = [8, 64], strides = [1, 1]} : vector<8x128xf32> to vector<8x64xf32>
    %c0_41 = arith.constant 0 : index
    %c0_42 = arith.constant 0 : index
    %117 = vector.load %arg5[%c0_41, %c0_42] : memref<8x128xf32, #tpu.memory_space<vmem>>, vector<8x64xf32>
    tpu.vector_store %arg5[%c0_41, %c0_42], %116 {strides = array<i32>} : memref<8x128xf32, #tpu.memory_space<vmem>>, vector<8x64xf32>,
    %c0_43 = arith.constant 0 : index
    %c64_44 = arith.constant 64 : index
    %118 = vector.load %arg5[%c0_43, %c64_44] : memref<8x128xf32, #tpu.memory_space<vmem>>, vector<8x32xf32>
    tpu.vector_store %arg5[%c0_43, %c64_44], %115 {strides = array<i32>} : memref<8x128xf32, #tpu.memory_space<vmem>>, vector<8x32xf32>,
    %cst_45 = arith.constant 0.000000e+00 : f32
    %119 = vector.broadcast %cst_45 : f32 to vector<8x32xf32>
    %c0_46 = arith.constant 0 : index
    %c96 = arith.constant 96 : index
    %120 = vector.load %arg5[%c0_46, %c96] : memref<8x128xf32, #tpu.memory_space<vmem>>, vector<8x32xf32>
    tpu.vector_store %arg5[%c0_46, %c96], %119 {strides = array<i32>} : memref<8x128xf32, #tpu.memory_space<vmem>>, vector<8x32xf32>,
    return
  }
}

</mosaic_0001>

<bundles_post_ra>
// kernel: _device_forward.1
= control target key start
LH: loop header
LB: loop body
LE: loop exit
PB: predicated region body
PF: predicated region fallthrough
CT: control target
= control target key end

     0   :  { %v655_v1 = vmov 0.0   ;;  %vm656_vm0 = vmmov 0   ;;  %vm50_vm1 = vcmask 261120   ;;  %s824_s0 = inlined_call_operand.vmem [shape: f32[8,32], index: 0, kind: input, shape index: {}]   ;;  %s825_s1 = inlined_call_operand.vmem [shape: f32[8,128], index: 1, kind: input, shape index: {}]   ;;  %s826_s2 = inlined_call_operand.vmem [shape: bf16[32,128], index: 2, kind: input, shape index: {}]   ;;  %s827_s3 = inlined_call_operand.vmem [shape: bf16[128,384], index: 3, kind: input, shape index: {}]   ;;  %s828_s4 = inlined_call_operand.vmem [shape: f32[8,128], index: 4, kind: input, shape index: {}]   ;;  %s829_s5 = inlined_call_operand.hbm [shape: f32[8,128], index: 5, kind: output, shape index: {}]  }
   0x1   :  { %v601_v0 = vld [vmem:[%s826_s2] sm:$0xff]   ;;  %537 = vmatprep.subr.bf16.mxu1 %v655_v1  ;;  %565 = vmatprep.subr.bf16.mxu0 %v655_v1  ;;  %v602_v2 = vld [vmem:[%s826_s2 + $0x8] sm:$0xff]  }
   0x2   :  { %538 = vmatpush3.bf16.msra.mxu1 %v601_v0  ;;  %541 = vmatprep.mubr.msk.bf16.mxu1 %vm656_vm0, %v655_v1  ;;  %v28_v3 = vld [vmem:[%s824_s0] sm:$0xff] }
   0x3   :  { %539 = vmatprep.subr.bf16.mxu1 %v655_v1  ;;  %573 = vmatprep.mubr.msk.bf16.mxu0 %vm656_vm0, %v655_v1  ;;  %v29_v4 = vpack.c.bf16 %v28_v3, %v28_v3 }
   0x6   :  { %540 = vmatpush3.bf16.msra.mxu1 %v602_v2 }
   0x7   :  { %545 = vmatprep.subr.bf16.mxu1 %v655_v1 }
   0x9   :  { %542 = vmatmul.mubr.msk.bf16.vlgmr.msra.gmra.mrb[0].mxu1 %vm50_vm1, %v29_v4 }
   0xa   :  { %561 = vmatprep.mubr.msk.bf16.mxu1 %vm656_vm0, %v655_v1 }
   0xb   :  { %10 = vsyncpa [#allocation3], 0  ;;  %v480_v5 = vld [vmem:[%s828_s4] ss:$0 sm:$0xff]  ;;  %v604_v13 = vld [vmem:[%s827_s3 + $0x18] ss:$12 sps:$4 sm:$0xff]   ;;  %v418_v62 = vlaneseq }
   0xc   :  { %v603_v12 = vld [vmem:[%s827_s3] ss:$12 sps:$4 sm:$0xff]   ;;  %v605_v18 = vld [vmem:[%s827_s3 + $0x30] ss:$12 sps:$4 sm:$0xff]   ;;  %v606_v19 = vld [vmem:[%s827_s3 + $0x48] ss:$12 sps:$4 sm:$0xff]  }
   0xd   :  { %546 = vmatpush3.bf16.msra.mxu1 %v603_v12  ;;  %v607_v20 = vld [vmem:[%s827_s3 + $0x60] ss:$12 sps:$4 sm:$0xff]   ;;  %v608_v21 = vld [vmem:[%s827_s3 + $0x78] ss:$12 sps:$4 sm:$0xff]   ;;  %v609_v22 = vld [vmem:[%s827_s3 + $0x90] ss:$12 sps:$4 sm:$0xff]  }
   0xe   :  { %547 = vmatprep.subr.bf16.mxu1 %v655_v1  ;;  %v610_v23 = vld [vmem:[%s827_s3 + $0xa8] ss:$12 sps:$4 sm:$0xff]   ;;  %v484_v28 = vld [vmem:[%s828_s4 + $0x1] ss:$0 sm:$0xff]  ;;  %v485_v30 = vld [vmem:[%s828_s4 + $0x2] ss:$0 sm:$0xff] }
   0xf   :  { %v611_v34 = vld [vmem:[%s827_s3 + $0x4] ss:$12 sps:$4 sm:$0xff]   ;;  %v612_v35 = vld [vmem:[%s827_s3 + $0x1c] ss:$12 sps:$4 sm:$0xff]   ;;  %v613_v36 = vld [vmem:[%s827_s3 + $0x34] ss:$12 sps:$4 sm:$0xff]  }
  0x10   :  { %566 = vmatpush3.bf16.msra.mxu0 %v611_v34  ;;  %v614_v37 = vld [vmem:[%s827_s3 + $0x4c] ss:$12 sps:$4 sm:$0xff]   ;;  %v486_v38 = vld [vmem:[%s828_s4 + $0x3] ss:$0 sm:$0xff]  ;;  %vm280_vm2 = vcmask 523264   ;;  %v419_v63 = vand.u32 127, %v418_v62 }
  0x11   :  { %548 = vmatpush3.bf16.msra.mxu1 %v604_v13  ;;  %567 = vmatprep.subr.bf16.mxu0 %v655_v1  ;;  %v615_v45 = vld [vmem:[%s827_s3 + $0x8] ss:$12 sps:$4 sm:$0xff]   ;;  %v616_v47 = vld [vmem:[%s827_s3 + $0x20] ss:$12 sps:$4 sm:$0xff]   ;;  %v617_v48 = vld [vmem:[%s827_s3 + $0x38] ss:$12 sps:$4 sm:$0xff]  }
  0x12   :  { %549 = vmatprep.subr.bf16.mxu1 %v655_v1  ;;  %v618_v49 = vld [vmem:[%s827_s3 + $0x50] ss:$12 sps:$4 sm:$0xff]   ;;  %v619_v50 = vld [vmem:[%s827_s3 + $0x68] ss:$12 sps:$4 sm:$0xff]   ;;  %v620_v51 = vld [vmem:[%s827_s3 + $0x80] ss:$12 sps:$4 sm:$0xff]  }
  0x13   :  { %v621_v52 = vld [vmem:[%s827_s3 + $0x98] ss:$12 sps:$4 sm:$0xff]   ;;  %v622_v53 = vld [vmem:[%s827_s3 + $0xb0] ss:$12 sps:$4 sm:$0xff]   ;;  %vm435_vm3 = vcmp.ge.s32.totalorder %v419_v63, 3  ;;  %vm436_vm4 = vcmp.lt.s32.totalorder %v419_v63, 7 }
  0x14   :  { %568 = vmatpush3.bf16.msra.mxu0 %v612_v35  ;;  %v495_v54 = vld [vmem:[%s828_s4 + $0x4] ss:$0 sm:$0xff]  ;;  %v501_v0 = vld [vmem:[%s828_s4 + $0x5] ss:$0 sm:$0xff]  ;;  %vm437_vm5 = vmand %vm435_vm3, %vm436_vm4  ;;  %vm422_vm6 = vcmp.lt.s32.totalorder %v419_v63, 3  ;;  %s657_s3 = smov 96  }
  0x15   :  { %550 = vmatpush3.bf16.msra.mxu1 %v605_v18  ;;  %569 = vmatprep.subr.bf16.mxu0 %v655_v1  ;;  %vm432_vm11 = vcmp.eq.s32.totalorder %v419_v63, 0  ;;  %vm446_vm12 = vcmp.eq.s32.totalorder %v419_v63, 1  ;;  %s658_s23 = smov [#allocation2]   ;;  %vm462_vm13 = vcmask 785920   ;;  %vm464_vm14 = vcmask 1048320  }
  0x16   :  { %551 = vmatprep.subr.bf16.mxu1 %v655_v1  ;;  %s472_s2 = sshll.u32 %s658_s23, 4  ;;  %s473_s2 = int_to_ptr.vmem [resolvable:$true] %s472_s2 }
  0x17   :  { %p636_p1 = scmp.lt.s32.totalorder %s473_s2, %s473_s2 }
  0x18   :  { %570 = vmatpush3.bf16.msra.mxu0 %v613_v36 }
  0x19   :  { %552 = vmatpush3.bf16.msra.mxu1 %v606_v19  ;;  %571 = vmatprep.subr.bf16.mxu0 %v655_v1  ;;  %v450_v19 = vld [vmem:[%s825_s1] sm:$0xff]  ;;  %s631_s1 = scalar_lea.vmem %s473_s2, 128 }
  0x1a   :  { %553 = vmatprep.subr.bf16.mxu1 %v655_v1  ;;  %p632_p0 = scmp.ne.s32.totalorder %s473_s2, %s631_s1  ;;  %p637_p2 = scmp.lt.s32.totalorder %s631_s1, %s631_s1 }
  0x1c   :  { %572 = vmatpush3.bf16.msra.mxu0 %v614_v37  ;;  %p638_p3 = por %p637_p2, %p636_p1 }
  0x1d   :  { %554 = vmatpush3.bf16.msra.mxu1 %v607_v20  ;;  %577 = vmatprep.subr.bf16.mxu0 %v655_v1 }
  0x1e   :  { %555 = vmatprep.subr.bf16.mxu1 %v655_v1  ;;  %p639_p4 = pnand %p638_p3, %p632_p0 }
  0x21   :  { %556 = vmatpush3.bf16.msra.mxu1 %v608_v21 }
  0x22   :  { %557 = vmatprep.subr.bf16.mxu1 %v655_v1 }
  0x25   :  { %558 = vmatpush3.bf16.msra.mxu1 %v609_v22 }
  0x26   :  { %559 = vmatprep.subr.bf16.mxu1 %v655_v1 }
  0x29   :  { %560 = vmatpush3.bf16.msra.mxu1 %v610_v23 }
  0xdc   :  { %v88_v6 = vpop.f32.mrb[0].mxu1 }
  0xdd   :  { %v89_v7 = vadd.f32 %v480_v5, %v88_v6  ;;  %v543_v8 = vpop.f32.mrb[1].mxu1 }
  0xde   :  { %v91_v9 = vpop.f32.mrb[2].mxu1 }
  0xdf   :  { %v94_v10 = vmax.f32 %v89_v7, 0.0  ;;  %v544_v11 = vpop.f32.mrb[3].mxu1  ;;  %v420_v9 = vcvt.s32.f32 %v419_v63 }
  0xe1   :  { %95 = vadd.xlane.f32.xlu0 %v94_v10 }
 0x16e   :  { %v96_v14 = vpop.xlane.xlu0 %95 }
 0x16f   :  { %v98_v15 = vmul.f32 0.0078125, %v96_v14 }
 0x171   :  { %v99_v16 = vsub.f32 %v94_v10, %v98_v15 }
 0x173   :  { %v100_v17 = vmul.f32 %v99_v16, %v99_v16 }
 0x175   :  { %101 = vadd.xlane.f32.xlu0 %v100_v17 }
 0x202   :  { %v102_v24 = vpop.xlane.xlu0 %101 }
 0x203   :  { %v103_v25 = vmul.f32 0.0078125, %v102_v24 }
 0x205   :  { %v104_v26 = vadd.f32 1e-05, %v103_v25 }
 0x207   :  { %623 = vrsqrt.f32 %v104_v26 }
 0x211   :  { %v624_v27 = vpop.eup %623 }
 0x212   :  { %v106_v29 = vmul.f32 %v624_v27, %v99_v16 }
 0x214   :  { %v111_v31 = vmul.f32 %v484_v28, %v106_v29 }
 0x216   :  { %v116_v32 = vadd.f32 %v485_v30, %v111_v31 }
 0x218   :  { %v157_v33 = vpack.c.bf16 %v116_v32, %v116_v32 }
 0x21a   :  { %562 = vmatmul.mubr.bf16.vlgmr.msra.gmra.mrb[4].mxu1 %v157_v33 }
 0x2ed   :  { %v244_v39 = vpop.f32.mrb[4].mxu1 }
 0x2ee   :  { %v245_v40 = vadd.f32 %v486_v38, %v244_v39  ;;  %v563_v41 = vpop.f32.mrb[5].mxu1 }
 0x2ef   :  { %v247_v42 = vpop.f32.mrb[6].mxu1 }
 0x2f0   :  { %625 = vtanh.f32 %v245_v40  ;;  %v564_v43 = vpop.f32.mrb[7].mxu1 }
 0x2fa   :  { %v626_v44 = vpop.eup %625 }
 0x2fb   :  { %v251_v46 = vpack.c.bf16 %v626_v44, %v626_v44 }
 0x2fd   :  { %574 = vmatmul.mubr.msk.bf16.vlgmr.msra.gmra.mrb[0].mxu0 %vm280_vm2, %v251_v46 }
 0x2fe   :  { %578 = vmatpush3.bf16.msra.mxu0 %v615_v45  ;;  %593 = vmatprep.mubr.msk.bf16.mxu0 %vm656_vm0, %v655_v1 }
 0x2ff   :  { %579 = vmatprep.subr.bf16.mxu0 %v655_v1 }
 0x302   :  { %580 = vmatpush3.bf16.msra.mxu0 %v616_v47 }
 0x303   :  { %581 = vmatprep.subr.bf16.mxu0 %v655_v1 }
 0x306   :  { %582 = vmatpush3.bf16.msra.mxu0 %v617_v48 }
 0x307   :  { %583 = vmatprep.subr.bf16.mxu0 %v655_v1 }
 0x30a   :  { %584 = vmatpush3.bf16.msra.mxu0 %v618_v49 }
 0x30b   :  { %585 = vmatprep.subr.bf16.mxu0 %v655_v1 }
 0x30e   :  { %586 = vmatpush3.bf16.msra.mxu0 %v619_v50 }
 0x30f   :  { %587 = vmatprep.subr.bf16.mxu0 %v655_v1 }
 0x312   :  { %588 = vmatpush3.bf16.msra.mxu0 %v620_v51 }
 0x313   :  { %589 = vmatprep.subr.bf16.mxu0 %v655_v1 }
 0x316   :  { %590 = vmatpush3.bf16.msra.mxu0 %v621_v52 }
 0x317   :  { %591 = vmatprep.subr.bf16.mxu0 %v655_v1 }
 0x31a   :  { %592 = vmatpush3.bf16.msra.mxu0 %v622_v53 }
 0x3d0   :  { %v318_v55 = vpop.f32.mrb[0].mxu0 }
 0x3d1   :  { %v319_v56 = vadd.f32 %v495_v54, %v318_v55  ;;  %v575_v57 = vpop.f32.mrb[1].mxu0 }
 0x3d2   :  { %v321_v58 = vpop.f32.mrb[2].mxu0 }
 0x3d3   :  { %v324_v59 = vmax.f32 %v319_v56, 0.0  ;;  %v576_v60 = vpop.f32.mrb[3].mxu0 }
 0x3d5   :  { %v325_v61 = vpack.c.bf16 %v324_v59, %v324_v59 }
 0x3d7   :  { %594 = vmatmul.mubr.bf16.vlgmr.msra.gmra.mrb[4].mxu0 %v325_v61 }
 0x4aa   :  { %v412_v2 = vpop.f32.mrb[4].mxu0 }
 0x4ab   :  { %v413_v3 = vadd.f32 %v501_v0, %v412_v2  ;;  %v595_v4 = vpop.f32.mrb[5].mxu0 }
 0x4ac   :  { %v415_v5 = vpop.f32.mrb[6].mxu0 }
 0x4ad   :  { %v596_v6 = vpop.f32.mrb[7].mxu0  ;;  %v438_v7 = vsel %vm437_vm5, %v413_v3, -inf  ;;  %v424_v8 = vsel %vm422_vm6, %v413_v3, -inf  ;;  %v451_v13 = vmul.f32 0.5, %v413_v3 }
 0x4ae   :  { %439 = vmax.xlane.f32.xlu1 %v438_v7 }
 0x4af   :  { %v452_v15 = vmul.f32 1.442695, %v451_v13 }
 0x4b1   :  { %627 = vpow2.f32 %v452_v15 }
 0x4b2   :  { %425 = vmax.xlane.f32.xlu1 %v424_v8 }
 0x4bb   :  { %v628_v16 = vpop.eup %627 }
 0x53b   :  { %v440_v10 = vpop.xlane.xlu1 %439 }
 0x53c   :  { %vm441_vm7 = vcmp.ge.f32.partialorder %v438_v7, %v440_v10 }
 0x53d   :  { %vm442_vm8 = vmand %vm437_vm5, %vm441_vm7 }
 0x53e   :  { %v443_v11 = vsel %vm442_vm8, %v420_v9, 65536.0 }
 0x53f   :  { %444 = vmin.xlane.f32.xlu0 %v443_v11  ;;  %v426_v12 = vpop.xlane.xlu1 %425 }
 0x540   :  { %vm427_vm9 = vcmp.ge.f32.partialorder %v424_v8, %v426_v12 }
 0x541   :  { %vm428_vm10 = vmand %vm422_vm6, %vm427_vm9 }
 0x542   :  { %v429_v14 = vsel %vm428_vm10, %v420_v9, 65536.0 }
 0x543   :  { %430 = vmin.xlane.f32.xlu1 %v429_v14 }
 0x555   :  { %455 = vrot.lane.b32.xlu0 %v628_v16, %s657_s3 }
 0x5cc   :  { %v445_v17 = vpop.xlane.xlu0 %444 }
 0x5cd   :  { %v510_v18 = vadd.f32 -3.0, %v445_v17 }
 0x5cf   :  { %v448_v23 = vsel %vm446_vm12, %v510_v18, 0.0 }
 0x5d0   :  { %v456_v20 = vpop.permute.xlu0 %455  ;;  %v431_v21 = vpop.xlane.xlu1 %430 }
 0x5d1   :  { %v458_v22 = vmul.f32 %v456_v20, %v450_v19  ;;  %v433_v24 = vsel %vm432_vm11, %v431_v21, 0.0 }
 0x5d2   :  { %v449_v25 = vadd.f32 %v448_v23, %v433_v24 }
 0x5d3   :  { %v459_v26 = vadd.f32 %v458_v22, %v413_v3 }
 0x5d4   :  { %461 = vst.msk [vmem:[#allocation2] sm:$0xff] %vm280_vm2, %v449_v25 }
 0x5d5   :  { %629 = vtanh.f32 %v459_v26 }
 0x5df   :  { %v630_v27 = vpop.eup %629 }
 0x5e0   :  { %463 = vst.msk [vmem:[#allocation2] sm:$0xff] %vm462_vm13, %v630_v27 }
 0x5e1   :  { %465 = vst.msk [vmem:[#allocation2] sm:$0xff] %vm464_vm14, %v655_v1 }
 0x5e2   :  { %642 = shalt.err (!%p639_p4)
}
 0x5e3   :  { %s643_s25 = scalar_lea.hbm %s829_s5, 128 }
 0x5e4   :  { %p644_p5 = scmp.ne.s32.totalorder %s829_s5, %s643_s25  ;;  %p647_p6 = scmp.lt.u32.totalorder %s643_s25, %s829_s5 }
 0x5e6   :  { %p649_p7 = pnand %p647_p6, %p644_p5 }
 0x5e8   :  { %652 = shalt.err (!%p649_p7)
}
 0x5e9   :  { %475 = dma.vmem_to_hbm [thread:$0]  %s473_s2, 128, %s829_s5, [#allocation3]  }
 0x5ea   :  { %653 = dma.done.wait [#allocation3], 128  }
 0x5eb   :  { %654 = vsyncadd [#allocation3], 4294967168 }
 0x5ec   :  { %479 = vsyncpa [#allocation3], 1 }

</bundles_post_ra>
